<compile_context>
chip_gen: v6e
topology: v6e:2x2x1
jax: 0.10.0
libtpu: 0.0.40
codegen_flags: <defaults>
</compile_context>

<pallas_src>
import functools
import math

import jax
import jax.numpy as jnp
from jax.experimental import pallas as pl
from jax.experimental.pallas import tpu as pltpu

# ---- config (mirrors CONFIG dict used by the PyTorch module) ----
EMB_DIM = 32          # CONFIG['emb_dim']
CONTEXT_LEN = 8       # CONFIG['context_length']  (== seq len here)
NUM_HEADS = 4         # CONFIG['num_heads']
HEAD_DIM = EMB_DIM // NUM_HEADS
DROPOUT_RATE = 0.0    # CONFIG['dropout_rate']  (eval -> identity)
QKV_BIAS = False      # CONFIG['qkv_bias']
HIDDEN = 4 * EMB_DIM  # FeedForward expansion
BATCH = 2
LN_EPS = 1e-5
NEG_INF = -1e30


def _layer_norm(v, g, b):
    mu = jnp.mean(v, axis=-1, keepdims=True)
    var = jnp.mean((v - mu) ** 2, axis=-1, keepdims=True)
    return (v - mu) * jax.lax.rsqrt(var + LN_EPS) * g + b


def decoder_kernel(x_ref, mask_ref, vec_ref, wqk_ref, wvo_ref, w1_ref, w2_ref,
                   out_ref, *, num_heads, head_dim, emb_dim):
    # x_ref: (R, D) activation rows resident in VMEM (R = B*T gridless, or T
    # per grid step on the v7x batch-parallel path).
    x = x_ref[...]                       # (R, D) f32
    R = x.shape[0]
    D = emb_dim
    H = num_heads
    hd = head_dim

    # Packed LN / bias rows: [g1, b1, bo, g2, b2, bf2, bf1, pad].
    vec = vec_ref[...]                   # (8, HIDDEN)
    g1, b1 = vec[0, :D], vec[1, :D]
    bo = vec[2, :D]
    g2, b2 = vec[3, :D], vec[4, :D]
    bf2 = vec[5, :D]
    bf1 = vec[6, :]                      # (HIDDEN,)

    # ---- LayerNorm 1 ----
    h = _layer_norm(x, g1, b1)

    # Precomputed additive mask (causal, block-diagonal per batch). (R, R)
    mask_add = mask_ref[...]

    # ---- causal multi-head attention (qkv_bias=False) ----
    # Fused projections: one (R,D)@(D,2D) for Q|K (scale folded into Wq) and
    # one (R,D)@(D,H*D) for V with the output projection pre-folded in.
    qk = jnp.dot(h, wqk_ref[...], preferred_element_type=jnp.float32)   # (R, 2D)
    vo = jnp.dot(h, wvo_ref[...], preferred_element_type=jnp.float32)   # (R, H*D)

    # Accumulator starts at the (broadcast) output-projection bias.
    attn = jnp.broadcast_to(bo, (R, D)).astype(jnp.float32)
    for hh in range(H):                                  # static unrolled head loop
        qh = qk[:, hh * hd:(hh + 1) * hd]                # (R, hd) static lane slice
        kh = qk[:, D + hh * hd:D + (hh + 1) * hd]        # (R, hd)
        voh = vo[:, hh * D:(hh + 1) * D]                 # (R, D)
        s = jnp.einsum("nd,md->nm", qh, kh,
                       preferred_element_type=jnp.float32)               # (R, R)
        s = s + mask_add
        s = s - jnp.max(s, axis=-1, keepdims=True)
        p = jnp.exp(s)
        p = p * pl.reciprocal(jnp.sum(p, axis=-1, keepdims=True), approx=True)
        # concat(heads) @ Wo  ==  sum_h  p_h @ (h @ Wv_h @ Wo_h)
        attn = attn + jnp.dot(p, voh, preferred_element_type=jnp.float32)

    x1 = x + attn                        # residual (dropout = identity)

    # ---- LayerNorm 2 + feed-forward ----
    h2 = _layer_norm(x1, g2, b2)
    ff = jnp.dot(h2, w1_ref[...], preferred_element_type=jnp.float32) + bf1
    ff = jax.nn.gelu(ff, approximate=True)               # GELU (tanh approximation)
    ff = jnp.dot(ff, w2_ref[...], preferred_element_type=jnp.float32) + bf2

    out_ref[...] = x1 + ff               # residual (dropout = identity)


@functools.partial(jax.jit, static_argnames=("batch_parallel",))
def decoder_block(x, params, *, batch_parallel=False):
    B, T, D = x.shape
    H = NUM_HEADS
    hd = D // H
    N = B * T

    # ---- pack weights in the wrapper (layout plumbing, outside the kernel) ----
    scale = 1.0 / math.sqrt(hd)
    # [Wq * (1/sqrt(hd)) | Wk]  -> (D, 2D) = (32, 64)
    wqk = jnp.concatenate([params["wq"] * scale, params["wk"]], axis=1)
    # Fold output projection into V per head: Wvo_h = Wv_h @ Wo_h -> (D, H*D) = (32, 128)
    wv, wo = params["wv"], params["wo"]
    wvo = jnp.concatenate(
        [wv[:, i * hd:(i + 1) * hd] @ wo[i * hd:(i + 1) * hd, :] for i in range(H)],
        axis=1)

    # Pack all 1-D LN/bias params into one (8, HIDDEN) slab.
    vec = jnp.zeros((8, HIDDEN), jnp.float32)
    vec = vec.at[0, :D].set(params["g1"])
    vec = vec.at[1, :D].set(params["b1"])
    vec = vec.at[2, :D].set(params["bo"])
    vec = vec.at[3, :D].set(params["g2"])
    vec = vec.at[4, :D].set(params["b2"])
    vec = vec.at[5, :D].set(params["bf2"])
    vec = vec.at[6, :].set(params["bf1"])

    x_flat = x.reshape(N, D)             # fold batch into the token/sublane axis
    kernel = functools.partial(decoder_kernel, num_heads=H, head_dim=hd, emb_dim=D)

    if batch_parallel:
        # v7x path: one grid step per batch element, sharded across the 2 TCs.
        # Mask is plain causal (T, T) since each program sees a single sequence.
        ri = jnp.arange(T)
        allowed = ri[:, None] >= ri[None, :]
        mask_add = jnp.where(allowed, 0.0, NEG_INF).astype(jnp.float32)

        def full(shape):
            return pl.BlockSpec(shape, lambda b: (0, 0))

        out = pl.pallas_call(
            kernel,
            out_shape=jax.ShapeDtypeStruct((N, D), jnp.float32),
            grid=(B,),
            in_specs=[pl.BlockSpec((T, D), lambda b: (b, 0)),   # x rows for batch b
                      full((T, T)),                              # causal mask
                      full((8, HIDDEN)),                         # LN/bias slab
                      full((D, 2 * D)),                          # [Wq*s | Wk]
                      full((D, H * D)),                          # folded Wvo
                      full((D, HIDDEN)),                         # W1
                      full((HIDDEN, D))],                        # W2
            out_specs=pl.BlockSpec((T, D), lambda b: (b, 0)),
            compiler_params=pltpu.CompilerParams(
                dimension_semantics=("parallel",)),
        )(x_flat, mask_add, vec, wqk, wvo, params["w1"], params["w2"])
    else:
        # v5e/v6e path: single gridless invocation on the whole (B*T, D) slab.
        # Mask is causal AND block-diagonal per batch.
        ri = jnp.arange(N)
        allowed = (ri[:, None] >= ri[None, :]) & \
                  ((ri[:, None] // T) == (ri[None, :] // T))
        mask_add = jnp.where(allowed, 0.0, NEG_INF).astype(jnp.float32)

        vmem = pl.BlockSpec(memory_space=pltpu.MemorySpace.VMEM)
        out = pl.pallas_call(
            kernel,
            out_shape=jax.ShapeDtypeStruct((N, D), jnp.float32),
            in_specs=[vmem] * 7,
            out_specs=vmem,
        )(x_flat, mask_add, vec, wqk, wvo, params["w1"], params["w2"])

    return out.reshape(B, T, D)


def _use_batch_parallel():
    """Split the batch across TensorCores only on v7x (2 TC/chip)."""
    try:
        kind = jax.devices()[0].device_kind.lower()
    except Exception:
        return False
    return ("v7" in kind) or ("7x" in kind)


def decoder_ref(x, p):
    """Pure-JAX reference of the same forward pass (for sanity check)."""
    def ln(v, g, b):
        mu = jnp.mean(v, axis=-1, keepdims=True)
        var = jnp.mean((v - mu) ** 2, axis=-1, keepdims=True)
        return (v - mu) * jax.lax.rsqrt(var + LN_EPS) * g + b

    B, T, D = x.shape
    H, hd = NUM_HEADS, D // NUM_HEADS
    h = ln(x, p["g1"], p["b1"])
    q = h @ p["wq"]; k = h @ p["wk"]; v = h @ p["wv"]
    q = q.reshape(B, T, H, hd).transpose(0, 2, 1, 3)
    k = k.reshape(B, T, H, hd).transpose(0, 2, 1, 3)
    v = v.reshape(B, T, H, hd).transpose(0, 2, 1, 3)
    s = jnp.einsum("bhqd,bhkd->bhqk", q, k) / math.sqrt(hd)
    mask = jnp.tril(jnp.ones((T, T), bool))
    s = jnp.where(mask, s, NEG_INF)
    a = jax.nn.softmax(s, axis=-1)
    o = jnp.einsum("bhqk,bhkd->bhqd", a, v).transpose(0, 2, 1, 3).reshape(B, T, D)
    attn = o @ p["wo"] + p["bo"]
    x1 = x + attn
    h2 = ln(x1, p["g2"], p["b2"])
    ff = jax.nn.gelu(h2 @ p["w1"] + p["bf1"], approximate=True)
    ff = ff @ p["w2"] + p["bf2"]
    return x1 + ff


def init_params(key):
    ks = jax.random.split(key, 12)
    s = 0.02
    return {
        "g1": 1.0 + 0.05 * jax.random.normal(ks[0], (EMB_DIM,), jnp.float32),
        "b1": s * jax.random.normal(ks[1], (EMB_DIM,), jnp.float32),
        "wq": s * jax.random.normal(ks[2], (EMB_DIM, EMB_DIM), jnp.float32),
        "wk": s * jax.random.normal(ks[3], (EMB_DIM, EMB_DIM), jnp.float32),
        "wv": s * jax.random.normal(ks[4], (EMB_DIM, EMB_DIM), jnp.float32),
        "wo": s * jax.random.normal(ks[5], (EMB_DIM, EMB_DIM), jnp.float32),
        "bo": s * jax.random.normal(ks[6], (EMB_DIM,), jnp.float32),
        "g2": 1.0 + 0.05 * jax.random.normal(ks[7], (EMB_DIM,), jnp.float32),
        "b2": s * jax.random.normal(ks[8], (EMB_DIM,), jnp.float32),
        "w1": s * jax.random.normal(ks[9], (EMB_DIM, HIDDEN), jnp.float32),
        "bf1": s * jax.random.normal(ks[10], (HIDDEN,), jnp.float32),
        "w2": s * jax.random.normal(ks[11], (HIDDEN, EMB_DIM), jnp.float32),
        "bf2": jnp.zeros((EMB_DIM,), jnp.float32),
    }


if __name__ == "__main__":
    key = jax.random.PRNGKey(0)
    kx, kp = jax.random.split(key)
    x = jax.random.normal(kx, (BATCH, CONTEXT_LEN, EMB_DIM), jnp.float32)
    params = init_params(kp)

    bp = _use_batch_parallel()
    out = jax.block_until_ready(decoder_block(x, params, batch_parallel=bp))

    ref = decoder_ref(x, params)
    assert out.shape == (BATCH, CONTEXT_LEN, EMB_DIM)
    assert jnp.allclose(out, ref, atol=1e-4, rtol=1e-4), "mismatch vs JAX reference"
    print("KERNEL_OK")
</pallas_src>

<mosaic_0001>
module attributes {stable_mosaic.version = 11 : i64} {
  func.func @decoder_kernel(%arg0: memref<16x32xf32, #tpu.memory_space<vmem>>, %arg1: memref<16x16xf32, #tpu.memory_space<vmem>>, %arg2: memref<8x128xf32, #tpu.memory_space<vmem>>, %arg3: memref<32x64xf32, #tpu.memory_space<vmem>>, %arg4: memref<32x128xf32, #tpu.memory_space<vmem>>, %arg5: memref<32x128xf32, #tpu.memory_space<vmem>>, %arg6: memref<128x32xf32, #tpu.memory_space<vmem>>, %arg7: memref<16x32xf32, #tpu.memory_space<vmem>>) attributes {dimension_semantics = [], scalar_prefetch = 0 : i64, scratch_operands = 0 : i64, tpu.core_type = #tpu.core_type<tc>} {
    %c0 = arith.constant 0 : index
    %c0_0 = arith.constant 0 : index
    %0 = vector.load %arg0[%c0, %c0_0] : memref<16x32xf32, #tpu.memory_space<vmem>>, vector<16x32xf32>
    %c0_1 = arith.constant 0 : index
    %c0_2 = arith.constant 0 : index
    %1 = vector.load %arg2[%c0_1, %c0_2] : memref<8x128xf32, #tpu.memory_space<vmem>>, vector<8x128xf32>
    %2 = vector.extract_strided_slice %1 {offsets = [0, 0], sizes = [1, 32], strides = [1, 1]} : vector<8x128xf32> to vector<1x32xf32>
    %3 = vector.shape_cast %2 : vector<1x32xf32> to vector<32xf32>
    %4 = vector.extract_strided_slice %1 {offsets = [1, 0], sizes = [1, 32], strides = [1, 1]} : vector<8x128xf32> to vector<1x32xf32>
    %5 = vector.shape_cast %4 : vector<1x32xf32> to vector<32xf32>
    %6 = vector.extract_strided_slice %1 {offsets = [2, 0], sizes = [1, 32], strides = [1, 1]} : vector<8x128xf32> to vector<1x32xf32>
    %7 = vector.shape_cast %6 : vector<1x32xf32> to vector<32xf32>
    %8 = vector.extract_strided_slice %1 {offsets = [3, 0], sizes = [1, 32], strides = [1, 1]} : vector<8x128xf32> to vector<1x32xf32>
    %9 = vector.shape_cast %8 : vector<1x32xf32> to vector<32xf32>
    %10 = vector.extract_strided_slice %1 {offsets = [4, 0], sizes = [1, 32], strides = [1, 1]} : vector<8x128xf32> to vector<1x32xf32>
    %11 = vector.shape_cast %10 : vector<1x32xf32> to vector<32xf32>
    %12 = vector.extract_strided_slice %1 {offsets = [5, 0], sizes = [1, 32], strides = [1, 1]} : vector<8x128xf32> to vector<1x32xf32>
    %13 = vector.shape_cast %12 : vector<1x32xf32> to vector<32xf32>
    %14 = vector.extract_strided_slice %1 {offsets = [6, 0], sizes = [1, 128], strides = [1, 1]} : vector<8x128xf32> to vector<1x128xf32>
    %15 = vector.shape_cast %14 : vector<1x128xf32> to vector<128xf32>
    %cst = arith.constant dense<0.000000e+00> : vector<16xf32>
    %16 = vector.multi_reduction <add>, %0, %cst [1] : vector<16x32xf32> to vector<16xf32>
    %17 = vector.shape_cast %16 : vector<16xf32> to vector<16x1xf32>
    %cst_3 = arith.constant 3.200000e+01 : f32
    %18 = vector.broadcast %cst_3 : f32 to vector<16x1xf32>
    %19 = arith.divf %17, %18 : vector<16x1xf32>
    %20 = vector.broadcast %19 : vector<16x1xf32> to vector<16x32xf32>
    %21 = arith.subf %0, %20 : vector<16x32xf32>
    %22 = arith.mulf %21, %21 : vector<16x32xf32>
    %cst_4 = arith.constant dense<0.000000e+00> : vector<16xf32>
    %23 = vector.multi_reduction <add>, %22, %cst_4 [1] : vector<16x32xf32> to vector<16xf32>
    %24 = vector.shape_cast %23 : vector<16xf32> to vector<16x1xf32>
    %cst_5 = arith.constant 3.200000e+01 : f32
    %25 = vector.broadcast %cst_5 : f32 to vector<16x1xf32>
    %26 = arith.divf %24, %25 : vector<16x1xf32>
    %27 = vector.broadcast %19 : vector<16x1xf32> to vector<16x32xf32>
    %28 = arith.subf %0, %27 : vector<16x32xf32>
    %cst_6 = arith.constant 9.99999974E-6 : f32
    %29 = vector.broadcast %cst_6 : f32 to vector<16x1xf32>
    %30 = arith.addf %26, %29 : vector<16x1xf32>
    %31 = math.rsqrt %30 : vector<16x1xf32>
    %32 = vector.broadcast %31 : vector<16x1xf32> to vector<16x32xf32>
    %33 = arith.mulf %28, %32 : vector<16x32xf32>
    %34 = vector.shape_cast %3 : vector<32xf32> to vector<1x32xf32>
    %35 = vector.broadcast %34 : vector<1x32xf32> to vector<16x32xf32>
    %36 = arith.mulf %33, %35 : vector<16x32xf32>
    %37 = vector.shape_cast %5 : vector<32xf32> to vector<1x32xf32>
    %38 = vector.broadcast %37 : vector<1x32xf32> to vector<16x32xf32>
    %39 = arith.addf %36, %38 : vector<16x32xf32>
    %c0_7 = arith.constant 0 : index
    %c0_8 = arith.constant 0 : index
    %40 = vector.load %arg1[%c0_7, %c0_8] : memref<16x16xf32, #tpu.memory_space<vmem>>, vector<16x16xf32>
    %c0_9 = arith.constant 0 : index
    %c0_10 = arith.constant 0 : index
    %41 = vector.load %arg3[%c0_9, %c0_10] : memref<32x64xf32, #tpu.memory_space<vmem>>, vector<32x64xf32>
    %cst_11 = arith.constant dense<0.000000e+00> : vector<16x64xf32>
    %42 = tpu.matmul %39, %41, %cst_11 {dimension_numbers = #tpu.dot_dimension_numbers<[1], [0], [0], [1], [0, 0, 1, 1], [], []>} : vector<16x32xf32>, vector<32x64xf32>, vector<16x64xf32> -> vector<16x64xf32>
    %c0_12 = arith.constant 0 : index
    %c0_13 = arith.constant 0 : index
    %43 = vector.load %arg4[%c0_12, %c0_13] : memref<32x128xf32, #tpu.memory_space<vmem>>, vector<32x128xf32>
    %cst_14 = arith.constant dense<0.000000e+00> : vector<16x128xf32>
    %44 = tpu.matmul %39, %43, %cst_14 {dimension_numbers = #tpu.dot_dimension_numbers<[1], [0], [0], [1], [0, 0, 1, 1], [], []>} : vector<16x32xf32>, vector<32x128xf32>, vector<16x128xf32> -> vector<16x128xf32>
    %45 = vector.shape_cast %7 : vector<32xf32> to vector<1x32xf32>
    %46 = vector.broadcast %45 : vector<1x32xf32> to vector<16x32xf32>
    %47 = vector.extract_strided_slice %42 {offsets = [0, 0], sizes = [16, 8], strides = [1, 1]} : vector<16x64xf32> to vector<16x8xf32>
    %48 = vector.extract_strided_slice %42 {offsets = [0, 32], sizes = [16, 8], strides = [1, 1]} : vector<16x64xf32> to vector<16x8xf32>
    %49 = vector.extract_strided_slice %44 {offsets = [0, 0], sizes = [16, 32], strides = [1, 1]} : vector<16x128xf32> to vector<16x32xf32>
    "tpu.trace_start"() <{level = 10 : i32, message = "nd,md->nm"}> : () -> ()
    %cst_15 = arith.constant dense<0.000000e+00> : vector<16x16xf32>
    %50 = tpu.matmul %47, %48, %cst_15 {dimension_numbers = #tpu.dot_dimension_numbers<[1], [1], [0], [0], [0, 0, 1, 0], [], []>} : vector<16x8xf32>, vector<16x8xf32>, vector<16x16xf32> -> vector<16x16xf32>
    "tpu.trace_stop"() : () -> ()
    %51 = arith.addf %50, %40 : vector<16x16xf32>
    %cst_16 = arith.constant dense<0xFF800000> : vector<16xf32>
    %52 = vector.multi_reduction <maximumf>, %51, %cst_16 [1] : vector<16x16xf32> to vector<16xf32>
    %53 = vector.shape_cast %52 : vector<16xf32> to vector<16x1xf32>
    %54 = vector.broadcast %53 : vector<16x1xf32> to vector<16x16xf32>
    %55 = arith.subf %51, %54 : vector<16x16xf32>
    %56 = math.exp %55 : vector<16x16xf32>
    %cst_17 = arith.constant dense<0.000000e+00> : vector<16xf32>
    %57 = vector.multi_reduction <add>, %56, %cst_17 [1] : vector<16x16xf32> to vector<16xf32>
    %58 = vector.shape_cast %57 : vector<16xf32> to vector<16x1xf32>
    %59 = tpu.reciprocal %58 {approx = true} : vector<16x1xf32> -> vector<16x1xf32>
    %60 = vector.broadcast %59 : vector<16x1xf32> to vector<16x16xf32>
    %61 = arith.mulf %56, %60 : vector<16x16xf32>
    %cst_18 = arith.constant dense<0.000000e+00> : vector<16x32xf32>
    %62 = tpu.matmul %61, %49, %cst_18 {dimension_numbers = #tpu.dot_dimension_numbers<[1], [0], [0], [1], [0, 0, 1, 1], [], []>} : vector<16x16xf32>, vector<16x32xf32>, vector<16x32xf32> -> vector<16x32xf32>
    %63 = arith.addf %46, %62 : vector<16x32xf32>
    %64 = vector.extract_strided_slice %42 {offsets = [0, 8], sizes = [16, 8], strides = [1, 1]} : vector<16x64xf32> to vector<16x8xf32>
    %65 = vector.extract_strided_slice %42 {offsets = [0, 40], sizes = [16, 8], strides = [1, 1]} : vector<16x64xf32> to vector<16x8xf32>
    %66 = vector.extract_strided_slice %44 {offsets = [0, 32], sizes = [16, 32], strides = [1, 1]} : vector<16x128xf32> to vector<16x32xf32>
    "tpu.trace_start"() <{level = 10 : i32, message = "nd,md->nm"}> : () -> ()
    %cst_19 = arith.constant dense<0.000000e+00> : vector<16x16xf32>
    %67 = tpu.matmul %64, %65, %cst_19 {dimension_numbers = #tpu.dot_dimension_numbers<[1], [1], [0], [0], [0, 0, 1, 0], [], []>} : vector<16x8xf32>, vector<16x8xf32>, vector<16x16xf32> -> vector<16x16xf32>
    "tpu.trace_stop"() : () -> ()
    %68 = arith.addf %67, %40 : vector<16x16xf32>
    %cst_20 = arith.constant dense<0xFF800000> : vector<16xf32>
    %69 = vector.multi_reduction <maximumf>, %68, %cst_20 [1] : vector<16x16xf32> to vector<16xf32>
    %70 = vector.shape_cast %69 : vector<16xf32> to vector<16x1xf32>
    %71 = vector.broadcast %70 : vector<16x1xf32> to vector<16x16xf32>
    %72 = arith.subf %68, %71 : vector<16x16xf32>
    %73 = math.exp %72 : vector<16x16xf32>
    %cst_21 = arith.constant dense<0.000000e+00> : vector<16xf32>
    %74 = vector.multi_reduction <add>, %73, %cst_21 [1] : vector<16x16xf32> to vector<16xf32>
    %75 = vector.shape_cast %74 : vector<16xf32> to vector<16x1xf32>
    %76 = tpu.reciprocal %75 {approx = true} : vector<16x1xf32> -> vector<16x1xf32>
    %77 = vector.broadcast %76 : vector<16x1xf32> to vector<16x16xf32>
    %78 = arith.mulf %73, %77 : vector<16x16xf32>
    %cst_22 = arith.constant dense<0.000000e+00> : vector<16x32xf32>
    %79 = tpu.matmul %78, %66, %cst_22 {dimension_numbers = #tpu.dot_dimension_numbers<[1], [0], [0], [1], [0, 0, 1, 1], [], []>} : vector<16x16xf32>, vector<16x32xf32>, vector<16x32xf32> -> vector<16x32xf32>
    %80 = arith.addf %63, %79 : vector<16x32xf32>
    %81 = vector.extract_strided_slice %42 {offsets = [0, 16], sizes = [16, 8], strides = [1, 1]} : vector<16x64xf32> to vector<16x8xf32>
    %82 = vector.extract_strided_slice %42 {offsets = [0, 48], sizes = [16, 8], strides = [1, 1]} : vector<16x64xf32> to vector<16x8xf32>
    %83 = vector.extract_strided_slice %44 {offsets = [0, 64], sizes = [16, 32], strides = [1, 1]} : vector<16x128xf32> to vector<16x32xf32>
    "tpu.trace_start"() <{level = 10 : i32, message = "nd,md->nm"}> : () -> ()
    %cst_23 = arith.constant dense<0.000000e+00> : vector<16x16xf32>
    %84 = tpu.matmul %81, %82, %cst_23 {dimension_numbers = #tpu.dot_dimension_numbers<[1], [1], [0], [0], [0, 0, 1, 0], [], []>} : vector<16x8xf32>, vector<16x8xf32>, vector<16x16xf32> -> vector<16x16xf32>
    "tpu.trace_stop"() : () -> ()
    %85 = arith.addf %84, %40 : vector<16x16xf32>
    %cst_24 = arith.constant dense<0xFF800000> : vector<16xf32>
    %86 = vector.multi_reduction <maximumf>, %85, %cst_24 [1] : vector<16x16xf32> to vector<16xf32>
    %87 = vector.shape_cast %86 : vector<16xf32> to vector<16x1xf32>
    %88 = vector.broadcast %87 : vector<16x1xf32> to vector<16x16xf32>
    %89 = arith.subf %85, %88 : vector<16x16xf32>
    %90 = math.exp %89 : vector<16x16xf32>
    %cst_25 = arith.constant dense<0.000000e+00> : vector<16xf32>
    %91 = vector.multi_reduction <add>, %90, %cst_25 [1] : vector<16x16xf32> to vector<16xf32>
    %92 = vector.shape_cast %91 : vector<16xf32> to vector<16x1xf32>
    %93 = tpu.reciprocal %92 {approx = true} : vector<16x1xf32> -> vector<16x1xf32>
    %94 = vector.broadcast %93 : vector<16x1xf32> to vector<16x16xf32>
    %95 = arith.mulf %90, %94 : vector<16x16xf32>
    %cst_26 = arith.constant dense<0.000000e+00> : vector<16x32xf32>
    %96 = tpu.matmul %95, %83, %cst_26 {dimension_numbers = #tpu.dot_dimension_numbers<[1], [0], [0], [1], [0, 0, 1, 1], [], []>} : vector<16x16xf32>, vector<16x32xf32>, vector<16x32xf32> -> vector<16x32xf32>
    %97 = arith.addf %80, %96 : vector<16x32xf32>
    %98 = vector.extract_strided_slice %42 {offsets = [0, 24], sizes = [16, 8], strides = [1, 1]} : vector<16x64xf32> to vector<16x8xf32>
    %99 = vector.extract_strided_slice %42 {offsets = [0, 56], sizes = [16, 8], strides = [1, 1]} : vector<16x64xf32> to vector<16x8xf32>
    %100 = vector.extract_strided_slice %44 {offsets = [0, 96], sizes = [16, 32], strides = [1, 1]} : vector<16x128xf32> to vector<16x32xf32>
    "tpu.trace_start"() <{level = 10 : i32, message = "nd,md->nm"}> : () -> ()
    %cst_27 = arith.constant dense<0.000000e+00> : vector<16x16xf32>
    %101 = tpu.matmul %98, %99, %cst_27 {dimension_numbers = #tpu.dot_dimension_numbers<[1], [1], [0], [0], [0, 0, 1, 0], [], []>} : vector<16x8xf32>, vector<16x8xf32>, vector<16x16xf32> -> vector<16x16xf32>
    "tpu.trace_stop"() : () -> ()
    %102 = arith.addf %101, %40 : vector<16x16xf32>
    %cst_28 = arith.constant dense<0xFF800000> : vector<16xf32>
    %103 = vector.multi_reduction <maximumf>, %102, %cst_28 [1] : vector<16x16xf32> to vector<16xf32>
    %104 = vector.shape_cast %103 : vector<16xf32> to vector<16x1xf32>
    %105 = vector.broadcast %104 : vector<16x1xf32> to vector<16x16xf32>
    %106 = arith.subf %102, %105 : vector<16x16xf32>
    %107 = math.exp %106 : vector<16x16xf32>
    %cst_29 = arith.constant dense<0.000000e+00> : vector<16xf32>
    %108 = vector.multi_reduction <add>, %107, %cst_29 [1] : vector<16x16xf32> to vector<16xf32>
    %109 = vector.shape_cast %108 : vector<16xf32> to vector<16x1xf32>
    %110 = tpu.reciprocal %109 {approx = true} : vector<16x1xf32> -> vector<16x1xf32>
    %111 = vector.broadcast %110 : vector<16x1xf32> to vector<16x16xf32>
    %112 = arith.mulf %107, %111 : vector<16x16xf32>
    %cst_30 = arith.constant dense<0.000000e+00> : vector<16x32xf32>
    %113 = tpu.matmul %112, %100, %cst_30 {dimension_numbers = #tpu.dot_dimension_numbers<[1], [0], [0], [1], [0, 0, 1, 1], [], []>} : vector<16x16xf32>, vector<16x32xf32>, vector<16x32xf32> -> vector<16x32xf32>
    %114 = arith.addf %97, %113 : vector<16x32xf32>
    %115 = arith.addf %0, %114 : vector<16x32xf32>
    %cst_31 = arith.constant dense<0.000000e+00> : vector<16xf32>
    %116 = vector.multi_reduction <add>, %115, %cst_31 [1] : vector<16x32xf32> to vector<16xf32>
    %117 = vector.shape_cast %116 : vector<16xf32> to vector<16x1xf32>
    %cst_32 = arith.constant 3.200000e+01 : f32
    %118 = vector.broadcast %cst_32 : f32 to vector<16x1xf32>
    %119 = arith.divf %117, %118 : vector<16x1xf32>
    %120 = vector.broadcast %119 : vector<16x1xf32> to vector<16x32xf32>
    %121 = arith.subf %115, %120 : vector<16x32xf32>
    %122 = arith.mulf %121, %121 : vector<16x32xf32>
    %cst_33 = arith.constant dense<0.000000e+00> : vector<16xf32>
    %123 = vector.multi_reduction <add>, %122, %cst_33 [1] : vector<16x32xf32> to vector<16xf32>
    %124 = vector.shape_cast %123 : vector<16xf32> to vector<16x1xf32>
    %cst_34 = arith.constant 3.200000e+01 : f32
    %125 = vector.broadcast %cst_34 : f32 to vector<16x1xf32>
    %126 = arith.divf %124, %125 : vector<16x1xf32>
    %127 = vector.broadcast %119 : vector<16x1xf32> to vector<16x32xf32>
    %128 = arith.subf %115, %127 : vector<16x32xf32>
    %cst_35 = arith.constant 9.99999974E-6 : f32
    %129 = vector.broadcast %cst_35 : f32 to vector<16x1xf32>
    %130 = arith.addf %126, %129 : vector<16x1xf32>
    %131 = math.rsqrt %130 : vector<16x1xf32>
    %132 = vector.broadcast %131 : vector<16x1xf32> to vector<16x32xf32>
    %133 = arith.mulf %128, %132 : vector<16x32xf32>
    %134 = vector.shape_cast %9 : vector<32xf32> to vector<1x32xf32>
    %135 = vector.broadcast %134 : vector<1x32xf32> to vector<16x32xf32>
    %136 = arith.mulf %133, %135 : vector<16x32xf32>
    %137 = vector.shape_cast %11 : vector<32xf32> to vector<1x32xf32>
    %138 = vector.broadcast %137 : vector<1x32xf32> to vector<16x32xf32>
    %139 = arith.addf %136, %138 : vector<16x32xf32>
    %c0_36 = arith.constant 0 : index
    %c0_37 = arith.constant 0 : index
    %140 = vector.load %arg5[%c0_36, %c0_37] : memref<32x128xf32, #tpu.memory_space<vmem>>, vector<32x128xf32>
    %cst_38 = arith.constant dense<0.000000e+00> : vector<16x128xf32>
    %141 = tpu.matmul %139, %140, %cst_38 {dimension_numbers = #tpu.dot_dimension_numbers<[1], [0], [0], [1], [0, 0, 1, 1], [], []>} : vector<16x32xf32>, vector<32x128xf32>, vector<16x128xf32> -> vector<16x128xf32>
    %142 = vector.shape_cast %15 : vector<128xf32> to vector<1x128xf32>
    %143 = vector.broadcast %142 : vector<1x128xf32> to vector<16x128xf32>
    %144 = arith.addf %141, %143 : vector<16x128xf32>
    %145 = arith.mulf %144, %144 : vector<16x128xf32>
    %146 = arith.mulf %144, %145 : vector<16x128xf32>
    %cst_39 = arith.constant 4.471500e-02 : f32
    %147 = vector.broadcast %cst_39 : f32 to vector<16x128xf32>
    %148 = arith.mulf %147, %146 : vector<16x128xf32>
    %149 = arith.addf %144, %148 : vector<16x128xf32>
    %cst_40 = arith.constant 0.797884583 : f32
    %150 = vector.broadcast %cst_40 : f32 to vector<16x128xf32>
    %151 = arith.mulf %150, %149 : vector<16x128xf32>
    %152 = math.tanh %151 : vector<16x128xf32>
    %cst_41 = arith.constant 1.000000e+00 : f32
    %153 = vector.broadcast %cst_41 : f32 to vector<16x128xf32>
    %154 = arith.addf %153, %152 : vector<16x128xf32>
    %cst_42 = arith.constant 5.000000e-01 : f32
    %155 = vector.broadcast %cst_42 : f32 to vector<16x128xf32>
    %156 = arith.mulf %155, %154 : vector<16x128xf32>
    %157 = arith.mulf %144, %156 : vector<16x128xf32>
    %c0_43 = arith.constant 0 : index
    %c0_44 = arith.constant 0 : index
    %158 = vector.load %arg6[%c0_43, %c0_44] : memref<128x32xf32, #tpu.memory_space<vmem>>, vector<128x32xf32>
    %cst_45 = arith.constant dense<0.000000e+00> : vector<16x32xf32>
    %159 = tpu.matmul %157, %158, %cst_45 {dimension_numbers = #tpu.dot_dimension_numbers<[1], [0], [0], [1], [0, 0, 1, 1], [], []>} : vector<16x128xf32>, vector<128x32xf32>, vector<16x32xf32> -> vector<16x32xf32>
    %160 = vector.shape_cast %13 : vector<32xf32> to vector<1x32xf32>
    %161 = vector.broadcast %160 : vector<1x32xf32> to vector<16x32xf32>
    %162 = arith.addf %159, %161 : vector<16x32xf32>
    %163 = arith.addf %115, %162 : vector<16x32xf32>
    %c0_46 = arith.constant 0 : index
    %c0_47 = arith.constant 0 : index
    %164 = vector.load %arg7[%c0_46, %c0_47] : memref<16x32xf32, #tpu.memory_space<vmem>>, vector<16x32xf32>
    tpu.vector_store %arg7[%c0_46, %c0_47], %163 {strides = array<i32>} : memref<16x32xf32, #tpu.memory_space<vmem>>, vector<16x32xf32>,
    return
  }
}

</mosaic_0001>

<bundles_post_ra>
// kernel: decoder_block.1
= control target key start
LH: loop header
LB: loop body
LE: loop exit
PB: predicated region body
PF: predicated region fallthrough
CT: control target
= control target key end

     0   :  { %vm30_vm0 = vcmask 261120   ;;  %s1912_s0 = inlined_call_operand.vmem [shape: f32[16,32], index: 0, kind: input, shape index: {}]   ;;  %s1913_s1 = inlined_call_operand.vmem [shape: f32[16,16], index: 1, kind: input, shape index: {}]   ;;  %s1914_s2 = inlined_call_operand.vmem [shape: f32[8,128], index: 2, kind: input, shape index: {}]   ;;  %s1915_s3 = inlined_call_operand.vmem [shape: f32[32,64], index: 3, kind: input, shape index: {}]   ;;  %s1916_s4 = inlined_call_operand.vmem [shape: f32[32,128], index: 4, kind: input, shape index: {}]   ;;  %s1917_s5 = inlined_call_operand.vmem [shape: f32[32,128], index: 5, kind: input, shape index: {}]   ;;  %s1918_s6 = inlined_call_operand.vmem [shape: f32[128,32], index: 6, kind: input, shape index: {}]   ;;  %s1919_s7 = inlined_call_operand.hbm [shape: f32[16,32], index: 7, kind: output, shape index: {}]  }
   0x1   :  { %v1661_v0 = vld [vmem:[%s1912_s0] sm:$0xff]  ;;  %v1666_v1 = vld [vmem:[%s1912_s0 + $0x8] sm:$0xff] }
   0x2   :  { %12 = vsyncpa [#allocation3], 0  ;;  %v31_v2 = vsel %vm30_vm0, %v1661_v0, 0.0  ;;  %v34_v3 = vsel %vm30_vm0, %v1666_v1, 0.0  ;;  %v75_v14 = vld [vmem:[%s1915_s3 + $0x18] sm:$0xff]  ;;  %v74_v15 = vld [vmem:[%s1915_s3 + $0x10] sm:$0xff]  ;;  %v58_v24 = vlaneseq }
   0x3   :  { %32 = vadd.xlane.f32.xlu0 %v31_v2  ;;  %1404 = vmatprep.subr.mxu0 %v75_v14  ;;  %v73_v16 = vld [vmem:[%s1915_s3 + $0x8] sm:$0xff]  ;;  %v72_v17 = vld [vmem:[%s1915_s3] sm:$0xff]  ;;  %v160_v18 = vld [vmem:[%s1916_s4 + $0x18] sm:$0xff]  ;;  %vm246_vm1 = vcmask 64512   ;;  %s1606_s20 = smov 88   ;;  %s1607_s21 = smov 96  }
   0x4   :  { %1405 = vmatpush3.msra.mxu0 %v75_v14  ;;  %v1691_v26 = vshrl.u32 %v58_v24, 7  ;;  %v1697_v28 = vld [vmem:[%s1914_s2] sm:$0xff]  ;;  %v159_v40 = vld [vmem:[%s1916_s4 + $0x10] sm:$0xff]  ;;  %v158_v41 = vld [vmem:[%s1916_s4 + $0x8] sm:$0xff]  ;;  %vm330_vm2 = vcmask 130048   ;;  %s1610_s26 = smov 112  }
   0x5   :  { %1406 = vmatprep.subr.mxu0 %v74_v15  ;;  %v157_v42 = vld [vmem:[%s1916_s4] sm:$0xff]  ;;  %s1608_s4 = smov 120   ;;  %v1752_v53 = vld [vmem:[%s1913_s1 + $0x8] sm:$0xff]  ;;  %s1611_s27 = smov 64  }
   0x6   :  { %1407 = vmatpush3.msra.mxu0 %v74_v15  ;;  %v60_v27 = vsub.s32 0, %v1691_v26  ;;  %v66_v29 = vsub.s32 1, %v1691_v26  ;;  %v1757_v55 = vld [vmem:[%s1913_s1] sm:$0xff]  ;;  %s1609_s1 = smov 80   ;;  %s1612_s0 = smov 72  }
   0x7   :  { %35 = vadd.xlane.f32.xlu0 %v34_v3  ;;  %1408 = vmatprep.subr.mxu0 %v73_v16  ;;  %s1613_s28 = smov 104   ;;  %s1614_s29 = smov 32  }
   0x8   :  { %1409 = vmatpush3.msra.mxu0 %v73_v16  ;;  %v61_v30 = vrot.slane %v1697_v28, %v60_v27  ;;  %v67_v33 = vrot.slane %v1697_v28, %v66_v29 }
   0x9   :  { %1410 = vmatprep.subr.mxu0 %v72_v17 }
   0xa   :  { %1411 = vmatpush3.msra.mxu0 %v72_v17 }
   0xb   :  { %1415 = vmatprep.subr.mxu0 %v160_v18 }
  0x8c   :  { %v33_v4 = vpop.xlane.xlu0 %32 }
  0x8d   :  { %v38_v5 = vmul.f32 0.03125, %v33_v4 }
  0x8f   :  { %v40_v6 = vsub.f32 %v1661_v0, %v38_v5 }
  0x90   :  { %v36_v7 = vpop.xlane.xlu0 %35 }
  0x91   :  { %v39_v8 = vmul.f32 0.03125, %v36_v7  ;;  %v42_v9 = vmul.f32 %v40_v6, %v40_v6 }
  0x93   :  { %v41_v10 = vsub.f32 %v1666_v1, %v39_v8  ;;  %v44_v11 = vsel %vm30_vm0, %v42_v9, 0.0 }
  0x94   :  { %45 = vadd.xlane.f32.xlu1 %v44_v11 }
  0x95   :  { %v43_v12 = vmul.f32 %v41_v10, %v41_v10 }
  0x97   :  { %v47_v13 = vsel %vm30_vm0, %v43_v12, 0.0 }
  0x98   :  { %48 = vadd.xlane.f32.xlu1 %v47_v13 }
 0x11d   :  { %v46_v19 = vpop.xlane.xlu1 %45 }
 0x11e   :  { %v50_v20 = vmul.f32 0.03125, %v46_v19 }
 0x120   :  { %v52_v21 = vadd.f32 1e-05, %v50_v20 }
 0x121   :  { %v49_v22 = vpop.xlane.xlu1 %48 }
 0x122   :  { %1540 = vrsqrt.f32 %v52_v21  ;;  %v51_v23 = vmul.f32 0.03125, %v49_v22 }
 0x124   :  { %v53_v25 = vadd.f32 1e-05, %v51_v23 }
 0x126   :  { %1542 = vrsqrt.f32 %v53_v25 }
 0x12f   :  { %v1541_v31 = vpop.eup %1540 }
 0x130   :  { %v56_v32 = vmul.f32 %v1541_v31, %v40_v6 }
 0x132   :  { %v62_v34 = vmul.f32 %v61_v30, %v56_v32 }
 0x133   :  { %v1543_v35 = vpop.eup %1542 }
 0x134   :  { %v57_v36 = vmul.f32 %v1543_v35, %v41_v10  ;;  %v68_v37 = vadd.f32 %v67_v33, %v62_v34 }
 0x136   :  { %v63_v38 = vmul.f32 %v61_v30, %v57_v36  ;;  %1412 = vmatprep.mubr.msk.f32.mxu0 %vm30_vm0, %v68_v37 }
 0x138   :  { %v69_v39 = vadd.f32 %v67_v33, %v63_v38 }
 0x13a   :  { %1413 = vmatmul.mubr.msk.f32.vlgmr.msra.gmra.mxu0 %vm30_vm0, %v69_v39 }
 0x13b   :  { %1416 = vmatpush3.msra.mxu0 %v160_v18  ;;  %1423 = vmatprep.mubr.msk.f32.mxu0 %vm30_vm0, %v68_v37 }
 0x13c   :  { %1417 = vmatprep.subr.mxu0 %v159_v40 }
 0x13d   :  { %1418 = vmatpush3.msra.mxu0 %v159_v40 }
 0x13e   :  { %1419 = vmatprep.subr.mxu0 %v158_v41 }
 0x13f   :  { %1420 = vmatpush3.msra.mxu0 %v158_v41 }
 0x140   :  { %1421 = vmatprep.subr.mxu0 %v157_v42 }
 0x141   :  { %1422 = vmatpush3.msra.mxu0 %v157_v42 }
 0x142   :  { %1424 = vmatmul.mubr.msk.f32.vlgmr.msra.gmra.mxu0 %vm30_vm0, %v69_v39 }
 0x1fa   :  { %v1715_v43 = vpop.f32.mrf.mxu0 }
 0x1fb   :  { %442 = vrot.lane.b32.xlu1 %v1715_v43, %s1606_s20  ;;  %244 = vrot.lane.b32.xlu0 %v1715_v43, %s1607_s21 }
 0x1fc   :  { %v1720_v44 = vpop.f32.mrf.mxu0 }
 0x1fd   :  { %1430 = vmatprep.mubr.msk.f32.mxu0 %vm246_vm1, %v1720_v44 }
 0x1ff   :  { %436 = vrot.lane.b32.xlu0 %v1720_v44, %s1608_s4  ;;  %242 = vrot.lane.b32.xlu1 %v1720_v44, %s1607_s21 }
 0x202   :  { %v1735_v49 = vpop.f32.mrf.mxu0 }
 0x203   :  { %440 = vrot.lane.b32.xlu1 %v1720_v44, %s1606_s20 }
 0x204   :  { %v1742_v51 = vpop.f32.mrf.mxu0 }
 0x207   :  { %438 = vrot.lane.b32.xlu1 %v1715_v43, %s1608_s4 }
 0x26d   :  { %v443_v45 = vpop.permute.xlu1 %442  ;;  %v245_v46 = vpop.permute.xlu0 %244 }
 0x26e   :  { %1426 = vmatprep.subr.msk.mxu0 %vm246_vm1, %v245_v46  ;;  %1440 = vmatprep.subr.msk.mxu1 %vm246_vm1, %v443_v45 }
 0x26f   :  { %1427 = vmatpush3.xpose.msk.msra.mxu0 %vm246_vm1, %v245_v46  ;;  %1441 = vmatpush3.xpose.msk.msra.mxu1 %vm246_vm1, %v443_v45 }
 0x271   :  { %v437_v47 = vpop.permute.xlu0 %436  ;;  %v243_v48 = vpop.permute.xlu1 %242 }
 0x272   :  { %1428 = vmatprep.subr.msk.mxu0 %vm246_vm1, %v243_v48  ;;  %1444 = vmatprep.mubr.msk.f32.mxu1 %vm246_vm1, %v437_v47  ;;  %v238_v47 = vsub.s32 2, %v1691_v26 }
 0x273   :  { %1429 = vmatpush3.xpose.msk.msra.mxu0 %vm246_vm1, %v243_v48 }
 0x274   :  { %1433 = vmatprep.subr.mxu0 %v1735_v49 }
 0x275   :  { %v441_v50 = vpop.permute.xlu1 %440 }
 0x276   :  { %1431 = vmatmul.mubr.msk.f32.vlgmr.msra.gmra.mxu0 %vm246_vm1, %v1715_v43  ;;  %1442 = vmatprep.subr.msk.mxu1 %vm246_vm1, %v441_v50 }
 0x277   :  { %1434 = vmatpush3.msra.mxu0 %v1735_v49  ;;  %1443 = vmatpush3.xpose.msk.msra.mxu1 %vm246_vm1, %v441_v50  ;;  %v239_v50 = vrot.slane %v1697_v28, %v238_v47 }
 0x278   :  { %1435 = vmatprep.subr.mxu0 %v1742_v51 }
 0x279   :  { %v439_v52 = vpop.permute.xlu1 %438  ;;  %1436 = vmatpush3.msra.mxu0 %v1742_v51 }
 0x27a   :  { %1445 = vmatmul.mubr.msk.f32.vlgmr.msra.gmra.mxu1 %vm246_vm1, %v439_v52 }
 0x336   :  { %v1432_v54 = vpop.f32.mrf.mxu0 }
 0x337   :  { %v327_v56 = vadd.f32 %v1432_v54, %v1752_v53 }
 0x338   :  { %v321_v57 = vpop.f32.mrf.mxu0 }
 0x339   :  { %v322_v58 = vadd.f32 %v321_v57, %v1757_v55  ;;  %v334_v59 = vsel %vm330_vm2, %v327_v56, -inf }
 0x33a   :  { %v1446_v60 = vpop.f32.mrf.mxu1  ;;  %335 = vmax.xlane.f32.xlu1 %v334_v59 }
 0x33b   :  { %v331_v61 = vsel %vm330_vm2, %v322_v58, -inf  ;;  %v524_v2 = vadd.f32 %v1446_v60, %v1752_v53 }
 0x33c   :  { %v518_v62 = vpop.f32.mrf.mxu1  ;;  %332 = vmax.xlane.f32.xlu0 %v331_v61 }
 0x33d   :  { %v519_v63 = vadd.f32 %v518_v62, %v1757_v55  ;;  %v530_v4 = vsel %vm330_vm2, %v524_v2, -inf }
 0x33f   :  { %v527_v3 = vsel %vm330_vm2, %v519_v63, -inf }
 0x340   :  { %528 = vmax.xlane.f32.xlu0 %v527_v3 }
 0x344   :  { %531 = vmax.xlane.f32.xlu0 %v530_v4 }
 0x3c3   :  { %v336_v5 = vpop.xlane.xlu1 %335 }
 0x3c4   :  { %v338_v6 = vsub.f32 %v327_v56, %v336_v5 }
 0x3c5   :  { %v333_v7 = vpop.xlane.xlu0 %332 }
 0x3c6   :  { %v341_v8 = vmul.f32 1.442695, %v338_v6  ;;  %v337_v9 = vsub.f32 %v322_v58, %v333_v7 }
 0x3c8   :  { %1544 = vpow2.f32 %v341_v8  ;;  %v339_v10 = vmul.f32 1.442695, %v337_v9 }
 0x3c9   :  { %v529_v11 = vpop.xlane.xlu0 %528 }
 0x3ca   :  { %1546 = vpow2.f32 %v339_v10  ;;  %v533_v12 = vsub.f32 %v519_v63, %v529_v11 }
 0x3cc   :  { %v535_v13 = vmul.f32 1.442695, %v533_v12 }
 0x3cd   :  { %v532_v14 = vpop.xlane.xlu0 %531 }
 0x3ce   :  { %1548 = vpow2.f32 %v535_v13  ;;  %v534_v15 = vsub.f32 %v524_v2, %v532_v14 }
 0x3d0   :  { %v537_v16 = vmul.f32 1.442695, %v534_v15 }
 0x3d2   :  { %1550 = vpow2.f32 %v537_v16 }
 0x3d5   :  { %v1545_v17 = vpop.eup %1544 }
 0x3d6   :  { %v346_v18 = vsel %vm330_vm2, %v1545_v17, 0.0 }
 0x3d7   :  { %v1547_v19 = vpop.eup %1546  ;;  %347 = vadd.xlane.f32.xlu1 %v346_v18 }
 0x3d8   :  { %v343_v20 = vsel %vm330_vm2, %v1547_v19, 0.0 }
 0x3d9   :  { %344 = vadd.xlane.f32.xlu0 %v343_v20 }
 0x3db   :  { %v1549_v21 = vpop.eup %1548 }
 0x3dc   :  { %v539_v22 = vsel %vm330_vm2, %v1549_v21, 0.0 }
 0x3dd   :  { %540 = vadd.xlane.f32.xlu0 %v539_v22 }
 0x3df   :  { %v1551_v23 = vpop.eup %1550 }
 0x3e0   :  { %v542_v24 = vsel %vm330_vm2, %v1551_v23, 0.0 }
 0x3e1   :  { %543 = vadd.xlane.f32.xlu1 %v542_v24 }
 0x3f2   :  { %551 = vrot.lane.b32.xlu1 %v1742_v51, %s1607_s21 }
 0x3f3   :  { %553 = vrot.lane.b32.xlu0 %v1735_v49, %s1607_s21 }
 0x3f6   :  { %646 = vrot.lane.b32.xlu1 %v1715_v43, %s1609_s1 }
 0x3f7   :  { %640 = vrot.lane.b32.xlu0 %v1720_v44, %s1610_s26 }
 0x3fa   :  { %644 = vrot.lane.b32.xlu1 %v1720_v44, %s1609_s1 }
 0x3fe   :  { %642 = vrot.lane.b32.xlu1 %v1715_v43, %s1610_s26 }
 0x460   :  { %v348_v25 = vpop.xlane.xlu1 %347 }
 0x461   :  { %1552 = vrcp.f32 %v348_v25 }
 0x462   :  { %v345_v27 = vpop.xlane.xlu0 %344 }
 0x463   :  { %1554 = vrcp.f32 %v345_v27 }
 0x466   :  { %v541_v29 = vpop.xlane.xlu0 %540 }
 0x467   :  { %1556 = vrcp.f32 %v541_v29 }
 0x46a   :  { %v544_v30 = vpop.xlane.xlu1 %543  ;;  %v554_v31 = vpop.permute.xlu0 %553 }
 0x46b   :  { %1558 = vrcp.f32 %v544_v30  ;;  %1447 = vmatprep.subr.mxu0 %v554_v31 }
 0x46e   :  { %v1553_v32 = vpop.eup %1552  ;;  %v552_v34 = vpop.permute.xlu1 %551 }
 0x46f   :  { %v352_v36 = vmul.f32 %v1553_v32, %v1545_v17  ;;  %v641_v42 = vpop.permute.xlu0 %640 }
 0x470   :  { %v1555_v33 = vpop.eup %1554 }
 0x471   :  { %v351_v35 = vmul.f32 %v1555_v33, %v1547_v19 }
 0x472   :  { %v647_v39 = vpop.permute.xlu1 %646 }
 0x473   :  { %1437 = vmatprep.mubr.msk.f32.mxu0 %vm330_vm2, %v351_v35 }
 0x474   :  { %v1557_v37 = vpop.eup %1556  ;;  %1438 = vmatmul.mubr.msk.f32.vlgmr.msra.gmra.mxu0 %vm330_vm2, %v352_v36 }
 0x475   :  { %1448 = vmatpush3.msra.mxu0 %v554_v31  ;;  %v547_v38 = vmul.f32 %v1557_v37, %v1549_v21 }
 0x476   :  { %1449 = vmatprep.subr.mxu0 %v552_v34  ;;  %v645_v45 = vpop.permute.xlu1 %644 }
 0x477   :  { %1450 = vmatpush3.msra.mxu0 %v552_v34  ;;  %1451 = vmatprep.mubr.msk.f32.mxu0 %vm330_vm2, %v547_v38 }
 0x478   :  { %v1559_v40 = vpop.eup %1558  ;;  %1454 = vmatprep.subr.msk.mxu0 %vm246_vm1, %v647_v39 }
 0x479   :  { %v548_v41 = vmul.f32 %v1559_v40, %v1551_v23 }
 0x47a   :  { %v643_v46 = vpop.permute.xlu1 %642 }
 0x47b   :  { %1452 = vmatmul.mubr.msk.f32.vlgmr.msra.gmra.mxu0 %vm330_vm2, %v548_v41 }
 0x47c   :  { %1455 = vmatpush3.xpose.msk.msra.mxu0 %vm246_vm1, %v647_v39  ;;  %1458 = vmatprep.mubr.msk.f32.mxu0 %vm246_vm1, %v641_v42 }
 0x47d   :  { %1456 = vmatprep.subr.msk.mxu0 %vm246_vm1, %v645_v45 }
 0x480   :  { %1457 = vmatpush3.xpose.msk.msra.mxu0 %vm246_vm1, %v645_v45 }
 0x483   :  { %1459 = vmatmul.mubr.msk.f32.vlgmr.msra.gmra.mxu0 %vm246_vm1, %v643_v46 }
 0x534   :  { %v1439_v48 = vpop.f32.mrf.mxu0 }
 0x535   :  { %v435_v54 = vadd.f32 %v1439_v48, %v239_v50 }
 0x536   :  { %v425_v52 = vpop.f32.mrf.mxu0 }
 0x537   :  { %v434_v57 = vadd.f32 %v425_v52, %v239_v50 }
 0x53b   :  { %v1453_v56 = vpop.f32.mrf.mxu0 }
 0x53c   :  { %v639_v58 = vadd.f32 %v1453_v56, %v435_v54 }
 0x53d   :  { %v629_v59 = vpop.f32.mrf.mxu0 }
 0x53e   :  { %v638_v60 = vadd.f32 %v629_v59, %v434_v57 }
 0x543   :  { %v1460_v61 = vpop.f32.mrf.mxu0 }
 0x544   :  { %v728_v62 = vadd.f32 %v1460_v61, %v1752_v53 }
 0x545   :  { %v722_v63 = vpop.f32.mrf.mxu0 }
 0x546   :  { %v723_v2 = vadd.f32 %v722_v63, %v1757_v55  ;;  %v734_v3 = vsel %vm330_vm2, %v728_v62, -inf }
 0x547   :  { %735 = vmax.xlane.f32.xlu1 %v734_v3 }
 0x548   :  { %v731_v4 = vsel %vm330_vm2, %v723_v2, -inf }
 0x549   :  { %732 = vmax.xlane.f32.xlu0 %v731_v4 }
 0x558   :  { %753 = vrot.lane.b32.xlu1 %v1742_v51, %s1611_s27 }
 0x55c   :  { %848 = vrot.lane.b32.xlu1 %v1715_v43, %s1612_s0 }
 0x560   :  { %846 = vrot.lane.b32.xlu1 %v1720_v44, %s1612_s0 }
 0x564   :  { %844 = vrot.lane.b32.xlu1 %v1715_v43, %s1613_s28 }
 0x5d0   :  { %v736_v5 = vpop.xlane.xlu1 %735 }
 0x5d1   :  { %v738_v6 = vsub.f32 %v728_v62, %v736_v5 }
 0x5d2   :  { %v733_v7 = vpop.xlane.xlu0 %732 }
 0x5d3   :  { %v741_v8 = vmul.f32 1.442695, %v738_v6  ;;  %v737_v9 = vsub.f32 %v723_v2, %v733_v7 }
 0x5d4   :  { %v754_v16 = vpop.permute.xlu1 %753 }
 0x5d5   :  { %1560 = vpow2.f32 %v741_v8  ;;  %v739_v10 = vmul.f32 1.442695, %v737_v9 }
 0x5d7   :  { %1562 = vpow2.f32 %v739_v10 }
 0x5d8   :  { %v849_v18 = vpop.permute.xlu1 %848 }
 0x5dc   :  { %v847_v23 = vpop.permute.xlu1 %846 }
 0x5e0   :  { %v845_v24 = vpop.permute.xlu1 %844 }
 0x5e2   :  { %v1561_v11 = vpop.eup %1560 }
 0x5e3   :  { %v746_v12 = vsel %vm330_vm2, %v1561_v11, 0.0 }
 0x5e4   :  { %v1563_v13 = vpop.eup %1562  ;;  %747 = vadd.xlane.f32.xlu0 %v746_v12  ;;  %v1086_v12 = vld [vmem:[%s1917_s5 + $0x10] sm:$0xff] }
 0x5e5   :  { %v743_v14 = vsel %vm330_vm2, %v1563_v13, 0.0 }
 0x5e8   :  { %744 = vadd.xlane.f32.xlu0 %v743_v14  ;;  %v1084_v14 = vld [vmem:[%s1917_s5] sm:$0xff] }
 0x5fe   :  { %755 = vrot.lane.b32.xlu0 %v1735_v49, %s1611_s27 }
 0x602   :  { %842 = vrot.lane.b32.xlu0 %v1720_v44, %s1613_s28 }
 0x66d   :  { %v748_v43 = vpop.xlane.xlu0 %747 }
 0x66e   :  { %1564 = vrcp.f32 %v748_v43 }
 0x671   :  { %v745_v15 = vpop.xlane.xlu0 %744 }
 0x672   :  { %1566 = vrcp.f32 %v745_v15 }
 0x675   :  { %v756_v17 = vpop.permute.xlu0 %755 }
 0x676   :  { %1461 = vmatprep.subr.mxu1 %v756_v17 }
 0x677   :  { %1462 = vmatpush3.msra.mxu1 %v756_v17 }
 0x678   :  { %1463 = vmatprep.subr.mxu1 %v754_v16 }
 0x679   :  { %1464 = vmatpush3.msra.mxu1 %v754_v16  ;;  %v843_v44 = vpop.permute.xlu0 %842 }
 0x67a   :  { %1468 = vmatprep.subr.msk.mxu1 %vm246_vm1, %v849_v18 }
 0x67b   :  { %v1565_v19 = vpop.eup %1564 }
 0x67c   :  { %v752_v22 = vmul.f32 %v1565_v19, %v1561_v11  ;;  %v1087_v11 = vld [vmem:[%s1917_s5 + $0x18] sm:$0xff] }
 0x67f   :  { %v1567_v20 = vpop.eup %1566 }
 0x680   :  { %v751_v21 = vmul.f32 %v1567_v20, %v1563_v13  ;;  %v1085_v13 = vld [vmem:[%s1917_s5 + $0x8] sm:$0xff]  ;;  %v1074_v20 = vsub.s32 3, %v1691_v26 }
 0x682   :  { %1465 = vmatprep.mubr.msk.f32.mxu1 %vm330_vm2, %v751_v21 }
 0x683   :  { %1466 = vmatmul.mubr.msk.f32.vlgmr.msra.gmra.mxu1 %vm330_vm2, %v752_v22  ;;  %v1075_v22 = vrot.slane %v1697_v28, %v1074_v20 }
 0x684   :  { %1469 = vmatpush3.xpose.msk.msra.mxu1 %vm246_vm1, %v849_v18  ;;  %1472 = vmatprep.mubr.msk.f32.mxu1 %vm246_vm1, %v843_v44  ;;  %v1080_v44 = vsub.s32 4, %v1691_v26 }
 0x685   :  { %1470 = vmatprep.subr.msk.mxu1 %vm246_vm1, %v847_v23 }
 0x688   :  { %1471 = vmatpush3.xpose.msk.msra.mxu1 %vm246_vm1, %v847_v23 }
 0x68b   :  { %1473 = vmatmul.mubr.msk.f32.vlgmr.msra.gmra.mxu1 %vm246_vm1, %v845_v24 }
 0x743   :  { %v1467_v25 = vpop.f32.mrf.mxu1 }
 0x744   :  { %v841_v27 = vadd.f32 %v1467_v25, %v639_v58 }
 0x745   :  { %v831_v29 = vpop.f32.mrf.mxu1 }
 0x746   :  { %v840_v30 = vadd.f32 %v831_v29, %v638_v60  ;;  %v1081_v29 = vrot.slane %v1697_v28, %v1080_v44 }
 0x74b   :  { %v1474_v31 = vpop.f32.mrf.mxu1 }
 0x74c   :  { %v930_v32 = vadd.f32 %v1474_v31, %v1752_v53 }
 0x74d   :  { %v924_v33 = vpop.f32.mrf.mxu1 }
 0x74e   :  { %v925_v34 = vadd.f32 %v924_v33, %v1757_v55  ;;  %v936_v35 = vsel %vm330_vm2, %v930_v32, -inf  ;;  %v1206_v33 = vld [vmem:[%s1918_s6 + $0x78] sm:$0xff] }
 0x74f   :  { %937 = vmax.xlane.f32.xlu1 %v936_v35  ;;  %1493 = vmatprep.subr.mxu1 %v1206_v33  ;;  %v1204_v35 = vld [vmem:[%s1918_s6 + $0x68] sm:$0xff] }
 0x750   :  { %v933_v36 = vsel %vm330_vm2, %v925_v34, -inf  ;;  %1494 = vmatpush3.msra.mxu1 %v1206_v33 }
 0x751   :  { %934 = vmax.xlane.f32.xlu0 %v933_v36  ;;  %v1203_v36 = vld [vmem:[%s1918_s6 + $0x60] sm:$0xff] }
 0x760   :  { %955 = vrot.lane.b32.xlu1 %v1742_v51, %s1614_s29 }
 0x7d8   :  { %v938_v37 = vpop.xlane.xlu1 %937 }
 0x7d9   :  { %v940_v38 = vsub.f32 %v930_v32, %v938_v37  ;;  %v1202_v37 = vld [vmem:[%s1918_s6 + $0x58] sm:$0xff] }
 0x7da   :  { %v935_v39 = vpop.xlane.xlu0 %934 }
 0x7db   :  { %v943_v40 = vmul.f32 1.442695, %v940_v38  ;;  %v939_v41 = vsub.f32 %v925_v34, %v935_v39  ;;  %v1205_v34 = vld [vmem:[%s1918_s6 + $0x70] sm:$0xff]  ;;  %v1200_v39 = vld [vmem:[%s1918_s6 + $0x48] sm:$0xff] }
 0x7dc   :  { %v956_v50 = vpop.permute.xlu1 %955  ;;  %1495 = vmatprep.subr.mxu1 %v1205_v34  ;;  %v1201_v38 = vld [vmem:[%s1918_s6 + $0x50] sm:$0xff] }
 0x7dd   :  { %1568 = vpow2.f32 %v943_v40  ;;  %v941_v42 = vmul.f32 1.442695, %v939_v41  ;;  %1496 = vmatpush3.msra.mxu1 %v1205_v34  ;;  %v1199_v40 = vld [vmem:[%s1918_s6 + $0x40] sm:$0xff]  ;;  %v1198_v41 = vld [vmem:[%s1918_s6 + $0x38] sm:$0xff] }
 0x7de   :  { %1497 = vmatprep.subr.mxu1 %v1204_v35 }
 0x7df   :  { %1570 = vpow2.f32 %v941_v42  ;;  %1498 = vmatpush3.msra.mxu1 %v1204_v35  ;;  %v1197_v42 = vld [vmem:[%s1918_s6 + $0x30] sm:$0xff] }
 0x7e0   :  { %1499 = vmatprep.subr.mxu1 %v1203_v36 }
 0x7e1   :  { %1500 = vmatpush3.msra.mxu1 %v1203_v36 }
 0x7e2   :  { %1501 = vmatprep.subr.mxu1 %v1202_v37 }
 0x7e3   :  { %1502 = vmatpush3.msra.mxu1 %v1202_v37 }
 0x7e4   :  { %1503 = vmatprep.subr.mxu1 %v1201_v38 }
 0x7e5   :  { %1504 = vmatpush3.msra.mxu1 %v1201_v38 }
 0x7e6   :  { %1505 = vmatprep.subr.mxu1 %v1200_v39 }
 0x7e7   :  { %1506 = vmatpush3.msra.mxu1 %v1200_v39 }
 0x7e8   :  { %1507 = vmatprep.subr.mxu1 %v1199_v40 }
 0x7e9   :  { %1508 = vmatpush3.msra.mxu1 %v1199_v40 }
 0x7ea   :  { %v1569_v53 = vpop.eup %1568  ;;  %1509 = vmatprep.subr.mxu1 %v1198_v41 }
 0x7eb   :  { %v948_v55 = vsel %vm330_vm2, %v1569_v53, 0.0  ;;  %1510 = vmatpush3.msra.mxu1 %v1198_v41 }
 0x7ec   :  { %v1571_v45 = vpop.eup %1570  ;;  %949 = vadd.xlane.f32.xlu0 %v948_v55  ;;  %1511 = vmatprep.subr.mxu1 %v1197_v42  ;;  %v1195_v55 = vld [vmem:[%s1918_s6 + $0x20] sm:$0xff] }
 0x7ed   :  { %v945_v46 = vsel %vm330_vm2, %v1571_v45, 0.0  ;;  %1512 = vmatpush3.msra.mxu1 %v1197_v42 }
 0x7f0   :  { %946 = vadd.xlane.f32.xlu0 %v945_v46  ;;  %v1193_v46 = vld [vmem:[%s1918_s6 + $0x10] sm:$0xff] }
 0x806   :  { %957 = vrot.lane.b32.xlu0 %v1735_v49, %s1614_s29 }
 0x875   :  { %v950_v47 = vpop.xlane.xlu0 %949 }
 0x876   :  { %1572 = vrcp.f32 %v950_v47  ;;  %v1192_v47 = vld [vmem:[%s1918_s6 + $0x8] sm:$0xff] }
 0x879   :  { %v947_v51 = vpop.xlane.xlu0 %946 }
 0x87a   :  { %1574 = vrcp.f32 %v947_v51  ;;  %v1191_v51 = vld [vmem:[%s1918_s6] sm:$0xff] }
 0x87d   :  { %v958_v48 = vpop.permute.xlu0 %957 }
 0x87e   :  { %1475 = vmatprep.subr.mxu0 %v958_v48 }
 0x87f   :  { %1476 = vmatpush3.msra.mxu0 %v958_v48  ;;  %v1090_v48 = vsub.s32 6, %v1691_v26 }
 0x880   :  { %1477 = vmatprep.subr.mxu0 %v956_v50 }
 0x881   :  { %1478 = vmatpush3.msra.mxu0 %v956_v50  ;;  %v1091_v50 = vrot.slane %v1697_v28, %v1090_v48 }
 0x882   :  { %1482 = vmatprep.subr.mxu0 %v1087_v11 }
 0x883   :  { %v1573_v52 = vpop.eup %1572 }
 0x884   :  { %v954_v57 = vmul.f32 %v1573_v52, %v1569_v53  ;;  %v1196_v53 = vld [vmem:[%s1918_s6 + $0x28] sm:$0xff] }
 0x885   :  { %1513 = vmatprep.subr.mxu1 %v1196_v53 }
 0x886   :  { %1514 = vmatpush3.msra.mxu1 %v1196_v53 }
 0x887   :  { %v1575_v54 = vpop.eup %1574  ;;  %1515 = vmatprep.subr.mxu1 %v1195_v55 }
 0x888   :  { %v953_v56 = vmul.f32 %v1575_v54, %v1571_v45  ;;  %v1194_v45 = vld [vmem:[%s1918_s6 + $0x18] sm:$0xff]  ;;  %1516 = vmatpush3.msra.mxu1 %v1195_v55  ;;  %s1615_s6 = smov [#allocation2]  }
 0x889   :  { %1517 = vmatprep.subr.mxu1 %v1194_v45  ;;  %s1295_s16 = sshll.u32 %s1615_s6, 4  ;;  %s1296_s16 = int_to_ptr.vmem [resolvable:$true] %s1295_s16 }
 0x88a   :  { %1479 = vmatprep.mubr.msk.f32.mxu0 %vm330_vm2, %v953_v56  ;;  %1518 = vmatpush3.msra.mxu1 %v1194_v45  ;;  %s1584_s2 = scalar_lea.vmem %s1296_s16, 256  ;;  %p1589_p1 = scmp.lt.s32.totalorder %s1296_s16, %s1296_s16 }
 0x88b   :  { %1480 = vmatmul.mubr.msk.f32.vlgmr.msra.gmra.mxu0 %vm330_vm2, %v954_v57  ;;  %1519 = vmatprep.subr.mxu1 %v1193_v46  ;;  %p1585_p0 = scmp.ne.s32.totalorder %s1296_s16, %s1584_s2  ;;  %p1590_p2 = scmp.lt.s32.totalorder %s1584_s2, %s1584_s2 }
 0x88c   :  { %1483 = vmatpush3.msra.mxu0 %v1087_v11  ;;  %1520 = vmatpush3.msra.mxu1 %v1193_v46 }
 0x88d   :  { %1484 = vmatprep.subr.mxu0 %v1086_v12  ;;  %1521 = vmatprep.subr.mxu1 %v1192_v47  ;;  %p1591_p3 = por %p1590_p2, %p1589_p1 }
 0x88e   :  { %1485 = vmatpush3.msra.mxu0 %v1086_v12  ;;  %1522 = vmatpush3.msra.mxu1 %v1192_v47 }
 0x88f   :  { %1486 = vmatprep.subr.mxu0 %v1085_v13  ;;  %1523 = vmatprep.subr.mxu1 %v1191_v51  ;;  %p1592_p4 = pnand %p1591_p3, %p1585_p0 }
 0x890   :  { %1487 = vmatpush3.msra.mxu0 %v1085_v13  ;;  %1524 = vmatpush3.msra.mxu1 %v1191_v51  ;;  %v1209_v13 = vsub.s32 5, %v1691_v26 }
 0x891   :  { %1488 = vmatprep.subr.mxu0 %v1084_v14 }
 0x892   :  { %1489 = vmatpush3.msra.mxu0 %v1084_v14  ;;  %v1210_v14 = vrot.slane %v1697_v28, %v1209_v13 }
 0x94b   :  { %v1481_v58 = vpop.f32.mrf.mxu0 }
 0x94c   :  { %v1043_v49 = vadd.f32 %v1481_v58, %v841_v27 }
 0x94d   :  { %v1033_v59 = vpop.f32.mrf.mxu0 }
 0x94e   :  { %v1822_v60 = vadd.f32 %v1043_v49, %v1666_v1  ;;  %v1042_v61 = vadd.f32 %v1033_v59, %v840_v30 }
 0x950   :  { %v1825_v62 = vadd.f32 %v1042_v61, %v1661_v0  ;;  %v1049_v63 = vsel %vm30_vm0, %v1822_v60, 0.0 }
 0x951   :  { %1050 = vadd.xlane.f32.xlu0 %v1049_v63 }
 0x952   :  { %v1046_v2 = vsel %vm30_vm0, %v1825_v62, 0.0 }
 0x953   :  { %1047 = vadd.xlane.f32.xlu1 %v1046_v2 }
 0x9da   :  { %v1051_v3 = vpop.xlane.xlu0 %1050 }
 0x9db   :  { %v1053_v4 = vmul.f32 0.03125, %v1051_v3 }
 0x9dc   :  { %v1048_v5 = vpop.xlane.xlu1 %1047 }
 0x9dd   :  { %v1055_v6 = vsub.f32 %v1822_v60, %v1053_v4  ;;  %v1052_v7 = vmul.f32 0.03125, %v1048_v5 }
 0x9df   :  { %v1054_v1 = vsub.f32 %v1825_v62, %v1052_v7  ;;  %v1057_v8 = vmul.f32 %v1055_v6, %v1055_v6 }
 0x9e1   :  { %v1061_v0 = vsel %vm30_vm0, %v1057_v8, 0.0  ;;  %v1056_v9 = vmul.f32 %v1054_v1, %v1054_v1 }
 0x9e2   :  { %1062 = vadd.xlane.f32.xlu1 %v1061_v0 }
 0x9e3   :  { %v1058_v10 = vsel %vm30_vm0, %v1056_v9, 0.0 }
 0x9e4   :  { %1059 = vadd.xlane.f32.xlu0 %v1058_v10 }
 0xa6b   :  { %v1063_v43 = vpop.xlane.xlu1 %1062 }
 0xa6c   :  { %v1065_v15 = vmul.f32 0.03125, %v1063_v43 }
 0xa6d   :  { %v1060_v16 = vpop.xlane.xlu0 %1059 }
 0xa6e   :  { %v1067_v17 = vadd.f32 1e-05, %v1065_v15  ;;  %v1064_v18 = vmul.f32 0.03125, %v1060_v16 }
 0xa70   :  { %1576 = vrsqrt.f32 %v1067_v17  ;;  %v1066_v19 = vadd.f32 1e-05, %v1064_v18 }
 0xa72   :  { %1578 = vrsqrt.f32 %v1066_v19 }
 0xa7d   :  { %v1577_v21 = vpop.eup %1576 }
 0xa7e   :  { %v1071_v23 = vmul.f32 %v1577_v21, %v1055_v6 }
 0xa7f   :  { %v1579_v24 = vpop.eup %1578 }
 0xa80   :  { %v1070_v25 = vmul.f32 %v1579_v24, %v1054_v1  ;;  %v1077_v27 = vmul.f32 %v1075_v22, %v1071_v23 }
 0xa82   :  { %v1076_v30 = vmul.f32 %v1075_v22, %v1070_v25  ;;  %v1083_v32 = vadd.f32 %v1081_v29, %v1077_v27 }
 0xa84   :  { %v1082_v31 = vadd.f32 %v1081_v29, %v1076_v30 }
 0xa86   :  { %1490 = vmatprep.mubr.msk.f32.mxu0 %vm30_vm0, %v1082_v31 }
 0xa87   :  { %1491 = vmatmul.mubr.msk.f32.vlgmr.msra.gmra.mxu0 %vm30_vm0, %v1083_v32 }
 0xb47   :  { %v1492_v52 = vpop.f32.mrf.mxu0 }
 0xb48   :  { %v1170_v54 = vadd.f32 %v1492_v52, %v1091_v50 }
 0xb49   :  { %v1164_v56 = vpop.f32.mrf.mxu0 }
 0xb4a   :  { %v1174_v57 = vmul.f32 %v1170_v54, %v1170_v54  ;;  %v1165_v58 = vadd.f32 %v1164_v56, %v1091_v50 }
 0xb4c   :  { %v1176_v49 = vmul.f32 %v1174_v57, %v1170_v54  ;;  %v1173_v59 = vmul.f32 %v1165_v58, %v1165_v58 }
 0xb4e   :  { %v1178_v61 = vmul.f32 0.044715, %v1176_v49  ;;  %v1175_v63 = vmul.f32 %v1173_v59, %v1165_v58 }
 0xb50   :  { %v1180_v2 = vadd.f32 %v1178_v61, %v1170_v54  ;;  %v1177_v3 = vmul.f32 0.044715, %v1175_v63 }
 0xb52   :  { %v1182_v4 = vmul.f32 0.7978846, %v1180_v2  ;;  %v1179_v5 = vadd.f32 %v1177_v3, %v1165_v58 }
 0xb54   :  { %1580 = vtanh.f32 %v1182_v4  ;;  %v1181_v6 = vmul.f32 0.7978846, %v1179_v5 }
 0xb56   :  { %1582 = vtanh.f32 %v1181_v6 }
 0xb61   :  { %v1581_v7 = vpop.eup %1580 }
 0xb62   :  { %v1186_v1 = vadd.f32 1.0, %v1581_v7 }
 0xb63   :  { %v1583_v8 = vpop.eup %1582 }
 0xb64   :  { %v1185_v0 = vadd.f32 1.0, %v1583_v8  ;;  %v1188_v9 = vmul.f32 0.5, %v1186_v1 }
 0xb66   :  { %v1187_v10 = vmul.f32 0.5, %v1185_v0  ;;  %v1190_v12 = vmul.f32 %v1188_v9, %v1170_v54 }
 0xb68   :  { %v1189_v11 = vmul.f32 %v1187_v10, %v1165_v58 }
 0xb6a   :  { %1525 = vmatprep.mubr.f32.mxu1 %v1189_v11 }
 0xb6b   :  { %1526 = vmatmul.mubr.f32.vlgmr.msra.gmra.mxu1 %v1190_v12 }
 0xc2b   :  { %v1527_v43 = vpop.f32.mrf.mxu1 }
 0xc2c   :  { %v1283_v15 = vadd.f32 %v1527_v43, %v1210_v14 }
 0xc2d   :  { %v1277_v16 = vpop.f32.mrf.mxu1 }
 0xc2e   :  { %v1287_v17 = vadd.f32 %v1283_v15, %v1822_v60  ;;  %v1278_v18 = vadd.f32 %v1277_v16, %v1210_v14 }
 0xc30   :  { %1289 = vst.msk [vmem:[#allocation2 + $0x8] sm:$0xff] %vm30_vm0, %v1287_v17  ;;  %v1286_v19 = vadd.f32 %v1278_v18, %v1825_v62 }
 0xc32   :  { %1288 = vst.msk [vmem:[#allocation2] sm:$0xff] %vm30_vm0, %v1286_v19 }
 0xc33   :  { %1595 = shalt.err (!%p1592_p4)
}
 0xc34   :  { %s1616_s17 = smov 128   ;;  %s1617_s18 = smov 8  }
 0xc35   :  { %1301 = dma.vmem_to_hbm [thread:$0]  %s1296_s16, 256, %s1919_s7, [#allocation3], %s1616_s17, %s1616_s17, %s1617_s18  }
 0xc36   :  { %1604 = dma.done.wait [#allocation3], 256  }
 0xc37   :  { %1605 = vsyncadd [#allocation3], 4294967040 }
 0xc38   :  { %1305 = vsyncpa [#allocation3], 1 }

</bundles_post_ra>
